<compile_context>
chip_gen: v6e
topology: v6e:2x2x1
jax: 0.10.0
libtpu: 0.0.40
codegen_flags: <defaults>
</compile_context>

<pallas_src>
import functools

import jax
import jax.numpy as jnp
import numpy as np
from jax.experimental import pallas as pl
from jax.experimental.pallas import tpu as pltpu

EPS = 1e-5


# --------------------------------------------------------------------------
# Kernels
# --------------------------------------------------------------------------
def _stats1_kernel(x_ref, w1_ref, sum_ref, sq_ref):
    """Per-image partial batch stats of the (bias-free) 1x1 conv output."""
    # x_ref: [Cin, HW] f32 ; w1_ref: [Cout, Cin] compute dtype
    xc = x_ref[...].astype(w1_ref.dtype)
    y = jnp.dot(w1_ref[...], xc, preferred_element_type=jnp.float32)
    sum_ref[...] = jnp.sum(y, axis=1, keepdims=True)
    sq_ref[...] = jnp.sum(y * y, axis=1, keepdims=True)


def _conv_kernel(x_ref, w1_ref, w3_ref, mask_ref, s1_ref, t1_ref,
                 z_ref, sum_ref, sq_ref, *, H, W):
    """1x1 conv -> BN1+ReLU -> 3x3 conv (9-tap accumulation) + partial stats."""
    HW = H * W
    xc = x_ref[...].astype(w1_ref.dtype)
    y = jnp.dot(w1_ref[...], xc, preferred_element_type=jnp.float32)
    # BN1 with precomputed global scale/shift.  Conv bias omitted: training
    # mode BN subtracts the batch mean, which cancels a per-channel bias.
    sel = jnp.maximum(y * s1_ref[...] + t1_ref[...], 0.0)      # f32 [Cout, HW]

    acc = None
    for k in range(9):                                         # static unroll
        dh, dw = k // 3 - 1, k % 3 - 1
        d = dh * W + dw                                        # flat lane shift
        if d == 0:
            tap = sel                                          # center: no roll/mask
        else:
            # roll within this image; wrap-around rows/cols are zeroed by the
            # precomputed combined boundary mask for this tap.
            tap = pltpu.roll(sel, shift=(-d) % HW, axis=1) * mask_ref[k:k + 1, :]
        p = jnp.dot(w3_ref[k], tap.astype(w3_ref.dtype),
                    preferred_element_type=jnp.float32)
        acc = p if acc is None else acc + p

    z_ref[...] = acc                                           # lane-dense store
    sum_ref[...] = jnp.sum(acc, axis=1, keepdims=True)
    sq_ref[...] = jnp.sum(acc * acc, axis=1, keepdims=True)


def _finalize_kernel(z_ref, s2_ref, t2_ref, out_ref):
    """BN2 (global scale/shift) + ReLU on the new channels."""
    out_ref[...] = jnp.maximum(z_ref[...] * s2_ref[...] + t2_ref[...], 0.0)


# --------------------------------------------------------------------------
# Host-side helpers
# --------------------------------------------------------------------------
def _boundary_masks(H, W):
    """Combined per-tap boundary masks over the flattened h*W+w lane axis."""
    hw = H * W
    h_idx = np.arange(hw) // W
    w_idx = np.arange(hw) % W
    rows = []
    for k in range(9):
        dh, dw = k // 3 - 1, k % 3 - 1
        m = np.ones(hw, np.float32)
        if dh == -1:
            m *= (h_idx >= 1)
        elif dh == 1:
            m *= (h_idx < H - 1)
        if dw == -1:
            m *= (w_idx >= 1)
        elif dw == 1:
            m *= (w_idx < W - 1)
        rows.append(m)
    return np.stack(rows).astype(np.float32)                   # [9, HW]


def _bn_scale_shift(sum_p, sq_p, gamma, beta, count):
    """Reduce per-image partial stats to BN scale/shift (tiny XLA work)."""
    s = jnp.sum(sum_p, axis=0)[:, 0]                           # [Cout]
    q = jnp.sum(sq_p, axis=0)[:, 0]
    mean = s / count
    # TODO(synk): one-pass E[y^2]-mean^2 can cancel for very large NHW; use a
    # shifted two-pass / Welford merge when tiling huge batches.
    var = q / count - mean * mean
    scale = gamma.astype(jnp.float32) * jax.lax.rsqrt(var + EPS)
    shift = beta.astype(jnp.float32) - scale * mean
    return scale.reshape(-1, 1), shift.reshape(-1, 1)


@functools.partial(jax.jit, static_argnames=("compute_dtype",))
def simple_block(x_nchw, w1, b1, g1, be1, w3, b2, g2, be2,
                 compute_dtype=jnp.bfloat16):
    """x_nchw: [N, Cin, H, W] -> [N, Cin+Cout, H, W] (PyTorch Simple_Block)."""
    del b1, b2   # exactly cancelled by training-mode BN mean subtraction
    N, Cin, H, W = x_nchw.shape
    Cout = w1.shape[0]
    HW = H * W
    count = N * HW

    # Free reshapes only (no transposes): channels -> sublanes, h*W+w -> lanes.
    x_flat = x_nchw.reshape(N, Cin, HW).astype(jnp.float32)
    w1_mat = w1[:, :, 0, 0].astype(compute_dtype)                       # [Cout, Cin]
    # tap k = kh*3 + kw  ->  weight slice w3[:, :, kh, kw]  ([Cout, Cout])
    w3_taps = jnp.transpose(w3, (2, 3, 0, 1)).reshape(9, Cout, Cout).astype(compute_dtype)
    masks = jnp.asarray(_boundary_masks(H, W))                          # [9, HW] f32

    # NOTE: with small Cin/Cout the MXU is mostly idle — this kernel is
    # VPU/XLU/HBM bound, which is why the slab-pass reductions above matter.
    cparams = pltpu.CompilerParams(
        dimension_semantics=("parallel",),     # v7x: shard images over both TCs
        vmem_limit_bytes=64 * 1024 * 1024,     # re-budget to <=~48MiB live on v7x
    )
    full = lambda shape: pl.BlockSpec(shape, lambda n, _s=shape: (0,) * len(_s))
    per_img = lambda c: pl.BlockSpec((None, c, HW), lambda n: (n, 0, 0))
    stat_spec = pl.BlockSpec((None, Cout, 1), lambda n: (n, 0, 0))
    stat_shape = jax.ShapeDtypeStruct((N, Cout, 1), jnp.float32)

    # ---- pass 1: partial stats of the 1x1 conv -----------------------------
    sum1, sq1 = pl.pallas_call(
        _stats1_kernel,
        grid=(N,),
        in_specs=[per_img(Cin), full((Cout, Cin))],
        out_specs=(stat_spec, stat_spec),
        out_shape=(stat_shape, stat_shape),
        compiler_params=cparams,
    )(x_flat, w1_mat)
    s1, t1 = _bn_scale_shift(sum1, sq1, g1, be1, count)

    # ---- pass 2: recompute 1x1 conv, BN1+ReLU, 9-tap 3x3 conv, stats -------
    z, sum2, sq2 = pl.pallas_call(
        functools.partial(_conv_kernel, H=H, W=W),
        grid=(N,),
        in_specs=[per_img(Cin), full((Cout, Cin)), full((9, Cout, Cout)),
                  full((9, HW)), full((Cout, 1)), full((Cout, 1))],
        out_specs=(per_img(Cout), stat_spec, stat_spec),
        out_shape=(jax.ShapeDtypeStruct((N, Cout, HW), jnp.float32),
                   stat_shape, stat_shape),
        compiler_params=cparams,
    )(x_flat, w1_mat, w3_taps, masks, s1, t1)
    s2, t2 = _bn_scale_shift(sum2, sq2, g2, be2, count)

    # ---- pass 3: BN2 + ReLU -------------------------------------------------
    out_new = pl.pallas_call(
        _finalize_kernel,
        grid=(N,),
        in_specs=[per_img(Cout), full((Cout, 1)), full((Cout, 1))],
        out_specs=per_img(Cout),
        out_shape=jax.ShapeDtypeStruct((N, Cout, HW), jnp.float32),
        compiler_params=cparams,
    )(z, s2, t2)

    out_new = out_new.reshape(N, Cout, H, W)                   # free reshape
    return jnp.concatenate([x_nchw.astype(jnp.float32), out_new], axis=1)


# --------------------------------------------------------------------------
# Pure-JAX reference (mirrors the PyTorch training-mode forward, f32)
# --------------------------------------------------------------------------
def ref_forward(x, w1, b1, g1, be1, w3, b2, g2, be2):
    dn = ('NCHW', 'OIHW', 'NCHW')

    def bn_relu(y, g, be):
        m = y.mean(axis=(0, 2, 3), keepdims=True)
        v = ((y - m) ** 2).mean(axis=(0, 2, 3), keepdims=True)
        return jax.nn.relu(g[None, :, None, None] * (y - m) *
                           jax.lax.rsqrt(v + EPS) + be[None, :, None, None])

    y = jax.lax.conv_general_dilated(x, w1, (1, 1), 'VALID',
                                     dimension_numbers=dn) + b1[None, :, None, None]
    sel = bn_relu(y, g1, be1)
    z = jax.lax.conv_general_dilated(sel, w3, (1, 1), ((1, 1), (1, 1)),
                                     dimension_numbers=dn) + b2[None, :, None, None]
    out = bn_relu(z, g2, be2)
    return jnp.concatenate([x, out], axis=1)


if __name__ == "__main__":
    N, Cin, H, W = 2, 4, 16, 16
    Cout = 8

    ks = jax.random.split(jax.random.PRNGKey(0), 10)
    x = jax.random.normal(ks[0], (N, Cin, H, W), jnp.float32)
    w1 = jax.random.normal(ks[1], (Cout, Cin, 1, 1), jnp.float32) * 0.5
    b1 = jax.random.normal(ks[2], (Cout,), jnp.float32) * 0.1
    g1 = 1.0 + jax.random.normal(ks[3], (Cout,), jnp.float32) * 0.1
    be1 = jax.random.normal(ks[4], (Cout,), jnp.float32) * 0.1
    w3 = jax.random.normal(ks[5], (Cout, Cout, 3, 3), jnp.float32) * 0.2
    b2 = jax.random.normal(ks[6], (Cout,), jnp.float32) * 0.1
    g2 = 1.0 + jax.random.normal(ks[7], (Cout,), jnp.float32) * 0.1
    be2 = jax.random.normal(ks[8], (Cout,), jnp.float32) * 0.1

    ref = jax.block_until_ready(ref_forward(x, w1, b1, g1, be1, w3, b2, g2, be2))

    # exact-precision path (f32 matmuls): tight check against the f32 reference
    out_f32 = jax.block_until_ready(
        simple_block(x, w1, b1, g1, be1, w3, b2, g2, be2,
                     compute_dtype=jnp.float32))
    assert out_f32.shape == (N, Cin + Cout, H, W), out_f32.shape
    np.testing.assert_allclose(np.asarray(out_f32), np.asarray(ref),
                               rtol=2e-3, atol=2e-3)

    # default bf16-MXU path (v6e/v7x optimization): loose bf16-appropriate bound
    out_bf16 = jax.block_until_ready(
        simple_block(x, w1, b1, g1, be1, w3, b2, g2, be2))
    assert out_bf16.shape == (N, Cin + Cout, H, W), out_bf16.shape
    np.testing.assert_allclose(np.asarray(out_bf16), np.asarray(ref),
                               rtol=1e-1, atol=1e-1)

    print("KERNEL_OK")
</pallas_src>

<mosaic_0001>
module attributes {stable_mosaic.version = 11 : i64} {
  func.func @_stats1_kernel(%arg0: i32, %arg1: memref<1x4x256xf32, #tpu.memory_space<vmem>>, %arg2: memref<8x4xf32, #tpu.memory_space<vmem>>, %arg3: memref<1x8x1xf32, #tpu.memory_space<vmem>>, %arg4: memref<1x8x1xf32, #tpu.memory_space<vmem>>) attributes {dimension_semantics = [#tpu.dimension_semantics<parallel>], iteration_bounds = array<i64: 2>, scalar_prefetch = 0 : i64, scratch_operands = 0 : i64, tpu.core_type = #tpu.core_type<tc>, window_params = [{transform_indices = @transform_0, window_bounds = array<i64: 1, 4, 256>}, {pipeline_mode = #tpu.pipeline_mode<synchronous>, transform_indices = @transform_1, window_bounds = array<i64: 8, 4>}, {transform_indices = @transform_2, window_bounds = array<i64: 1, 8, 1>}, {transform_indices = @transform_3, window_bounds = array<i64: 1, 8, 1>}]} {
    %c0 = arith.constant 0 : index
    %c0_0 = arith.constant 0 : index
    %c0_1 = arith.constant 0 : index
    %0 = vector.load %arg1[%c0, %c0_0, %c0_1] : memref<1x4x256xf32, #tpu.memory_space<vmem>>, vector<1x4x256xf32>
    %1 = vector.shape_cast %0 : vector<1x4x256xf32> to vector<4x256xf32>
    %c0_2 = arith.constant 0 : index
    %c0_3 = arith.constant 0 : index
    %2 = vector.load %arg2[%c0_2, %c0_3] : memref<8x4xf32, #tpu.memory_space<vmem>>, vector<8x4xf32>
    %cst = arith.constant dense<0.000000e+00> : vector<8x256xf32>
    %3 = tpu.matmul %2, %1, %cst {dimension_numbers = #tpu.dot_dimension_numbers<[1], [0], [0], [1], [0, 0, 1, 1], [], []>} : vector<8x4xf32>, vector<4x256xf32>, vector<8x256xf32> -> vector<8x256xf32>
    %cst_4 = arith.constant dense<0.000000e+00> : vector<8xf32>
    %4 = vector.multi_reduction <add>, %3, %cst_4 [1] : vector<8x256xf32> to vector<8xf32>
    %5 = vector.shape_cast %4 : vector<8xf32> to vector<8x1xf32>
    %c0_5 = arith.constant 0 : index
    %c0_6 = arith.constant 0 : index
    %c0_7 = arith.constant 0 : index
    %6 = vector.load %arg3[%c0_5, %c0_6, %c0_7] : memref<1x8x1xf32, #tpu.memory_space<vmem>>, vector<1x8x1xf32>
    %7 = vector.shape_cast %6 : vector<1x8x1xf32> to vector<8x1xf32>
    %8 = vector.shape_cast %5 : vector<8x1xf32> to vector<1x8x1xf32>
    tpu.vector_store %arg3[%c0_5, %c0_6, %c0_7], %8 {strides = array<i32>} : memref<1x8x1xf32, #tpu.memory_space<vmem>>, vector<1x8x1xf32>,
    %9 = arith.mulf %3, %3 : vector<8x256xf32>
    %cst_8 = arith.constant dense<0.000000e+00> : vector<8xf32>
    %10 = vector.multi_reduction <add>, %9, %cst_8 [1] : vector<8x256xf32> to vector<8xf32>
    %11 = vector.shape_cast %10 : vector<8xf32> to vector<8x1xf32>
    %c0_9 = arith.constant 0 : index
    %c0_10 = arith.constant 0 : index
    %c0_11 = arith.constant 0 : index
    %12 = vector.load %arg4[%c0_9, %c0_10, %c0_11] : memref<1x8x1xf32, #tpu.memory_space<vmem>>, vector<1x8x1xf32>
    %13 = vector.shape_cast %12 : vector<1x8x1xf32> to vector<8x1xf32>
    %14 = vector.shape_cast %11 : vector<8x1xf32> to vector<1x8x1xf32>
    tpu.vector_store %arg4[%c0_9, %c0_10, %c0_11], %14 {strides = array<i32>} : memref<1x8x1xf32, #tpu.memory_space<vmem>>, vector<1x8x1xf32>,
    return
  }
  func.func @transform_0(%arg0: i32) -> (i32, i32, i32) {
    %c0_i32 = arith.constant 0 : i32
    %c0_i32_0 = arith.constant 0 : i32
    %c0_i32_1 = arith.constant 0 : i32
    return %arg0, %c0_i32, %c0_i32_0 : i32, i32, i32
  }
  func.func @transform_1(%arg0: i32) -> (i32, i32) {
    %c0_i32 = arith.constant 0 : i32
    %c0_i32_0 = arith.constant 0 : i32
    %c0_i32_1 = arith.constant 0 : i32
    return %c0_i32, %c0_i32_0 : i32, i32
  }
  func.func @transform_2(%arg0: i32) -> (i32, i32, i32) {
    %c0_i32 = arith.constant 0 : i32
    %c0_i32_0 = arith.constant 0 : i32
    %c0_i32_1 = arith.constant 0 : i32
    return %arg0, %c0_i32, %c0_i32_0 : i32, i32, i32
  }
  func.func @transform_3(%arg0: i32) -> (i32, i32, i32) {
    %c0_i32 = arith.constant 0 : i32
    %c0_i32_0 = arith.constant 0 : i32
    %c0_i32_1 = arith.constant 0 : i32
    return %arg0, %c0_i32, %c0_i32_0 : i32, i32, i32
  }
}

module attributes {stable_mosaic.version = 11 : i64} {
  func.func @_finalize_kernel(%arg0: i32, %arg1: memref<1x8x256xf32, #tpu.memory_space<vmem>>, %arg2: memref<8x1xf32, #tpu.memory_space<vmem>>, %arg3: memref<8x1xf32, #tpu.memory_space<vmem>>, %arg4: memref<1x8x256xf32, #tpu.memory_space<vmem>>) attributes {dimension_semantics = [#tpu.dimension_semantics<parallel>], iteration_bounds = array<i64: 2>, scalar_prefetch = 0 : i64, scratch_operands = 0 : i64, tpu.core_type = #tpu.core_type<tc>, window_params = [{transform_indices = @transform_0, window_bounds = array<i64: 1, 8, 256>}, {pipeline_mode = #tpu.pipeline_mode<synchronous>, transform_indices = @transform_1, window_bounds = array<i64: 8, 1>}, {pipeline_mode = #tpu.pipeline_mode<synchronous>, transform_indices = @transform_2, window_bounds = array<i64: 8, 1>}, {transform_indices = @transform_3, window_bounds = array<i64: 1, 8, 256>}]} {
    %c0 = arith.constant 0 : index
    %c0_0 = arith.constant 0 : index
    %c0_1 = arith.constant 0 : index
    %0 = vector.load %arg1[%c0, %c0_0, %c0_1] : memref<1x8x256xf32, #tpu.memory_space<vmem>>, vector<1x8x256xf32>
    %1 = vector.shape_cast %0 : vector<1x8x256xf32> to vector<8x256xf32>
    %c0_2 = arith.constant 0 : index
    %c0_3 = arith.constant 0 : index
    %2 = vector.load %arg2[%c0_2, %c0_3] : memref<8x1xf32, #tpu.memory_space<vmem>>, vector<8x1xf32>
    %3 = vector.broadcast %2 : vector<8x1xf32> to vector<8x256xf32>
    %4 = arith.mulf %1, %3 : vector<8x256xf32>
    %c0_4 = arith.constant 0 : index
    %c0_5 = arith.constant 0 : index
    %5 = vector.load %arg3[%c0_4, %c0_5] : memref<8x1xf32, #tpu.memory_space<vmem>>, vector<8x1xf32>
    %6 = vector.broadcast %5 : vector<8x1xf32> to vector<8x256xf32>
    %7 = arith.addf %4, %6 : vector<8x256xf32>
    %cst = arith.constant 0.000000e+00 : f32
    %8 = vector.broadcast %cst : f32 to vector<8x256xf32>
    %9 = arith.maximumf %7, %8 : vector<8x256xf32>
    %c0_6 = arith.constant 0 : index
    %c0_7 = arith.constant 0 : index
    %c0_8 = arith.constant 0 : index
    %10 = vector.load %arg4[%c0_6, %c0_7, %c0_8] : memref<1x8x256xf32, #tpu.memory_space<vmem>>, vector<1x8x256xf32>
    %11 = vector.shape_cast %10 : vector<1x8x256xf32> to vector<8x256xf32>
    %12 = vector.shape_cast %9 : vector<8x256xf32> to vector<1x8x256xf32>
    tpu.vector_store %arg4[%c0_6, %c0_7, %c0_8], %12 {strides = array<i32>} : memref<1x8x256xf32, #tpu.memory_space<vmem>>, vector<1x8x256xf32>,
    return
  }
  func.func @transform_0(%arg0: i32) -> (i32, i32, i32) {
    %c0_i32 = arith.constant 0 : i32
    %c0_i32_0 = arith.constant 0 : i32
    %c0_i32_1 = arith.constant 0 : i32
    return %arg0, %c0_i32, %c0_i32_0 : i32, i32, i32
  }
  func.func @transform_1(%arg0: i32) -> (i32, i32) {
    %c0_i32 = arith.constant 0 : i32
    %c0_i32_0 = arith.constant 0 : i32
    %c0_i32_1 = arith.constant 0 : i32
    return %c0_i32, %c0_i32_0 : i32, i32
  }
  func.func @transform_2(%arg0: i32) -> (i32, i32) {
    %c0_i32 = arith.constant 0 : i32
    %c0_i32_0 = arith.constant 0 : i32
    %c0_i32_1 = arith.constant 0 : i32
    return %c0_i32, %c0_i32_0 : i32, i32
  }
  func.func @transform_3(%arg0: i32) -> (i32, i32, i32) {
    %c0_i32 = arith.constant 0 : i32
    %c0_i32_0 = arith.constant 0 : i32
    %c0_i32_1 = arith.constant 0 : i32
    return %arg0, %c0_i32, %c0_i32_0 : i32, i32, i32
  }
}

module attributes {stable_mosaic.version = 11 : i64} {
  func.func @_conv_kernel(%arg0: i32, %arg1: memref<1x4x256xf32, #tpu.memory_space<vmem>>, %arg2: memref<8x4xf32, #tpu.memory_space<vmem>>, %arg3: memref<9x8x8xf32, #tpu.memory_space<vmem>>, %arg4: memref<9x256xf32, #tpu.memory_space<vmem>>, %arg5: memref<8x1xf32, #tpu.memory_space<vmem>>, %arg6: memref<8x1xf32, #tpu.memory_space<vmem>>, %arg7: memref<1x8x256xf32, #tpu.memory_space<vmem>>, %arg8: memref<1x8x1xf32, #tpu.memory_space<vmem>>, %arg9: memref<1x8x1xf32, #tpu.memory_space<vmem>>) attributes {dimension_semantics = [#tpu.dimension_semantics<parallel>], iteration_bounds = array<i64: 2>, scalar_prefetch = 0 : i64, scratch_operands = 0 : i64, tpu.core_type = #tpu.core_type<tc>, window_params = [{transform_indices = @transform_0, window_bounds = array<i64: 1, 4, 256>}, {pipeline_mode = #tpu.pipeline_mode<synchronous>, transform_indices = @transform_1, window_bounds = array<i64: 8, 4>}, {pipeline_mode = #tpu.pipeline_mode<synchronous>, transform_indices = @transform_2, window_bounds = array<i64: 9, 8, 8>}, {pipeline_mode = #tpu.pipeline_mode<synchronous>, transform_indices = @transform_3, window_bounds = array<i64: 9, 256>}, {pipeline_mode = #tpu.pipeline_mode<synchronous>, transform_indices = @transform_4, window_bounds = array<i64: 8, 1>}, {pipeline_mode = #tpu.pipeline_mode<synchronous>, transform_indices = @transform_5, window_bounds = array<i64: 8, 1>}, {transform_indices = @transform_6, window_bounds = array<i64: 1, 8, 256>}, {transform_indices = @transform_7, window_bounds = array<i64: 1, 8, 1>}, {transform_indices = @transform_8, window_bounds = array<i64: 1, 8, 1>}]} {
    %c0 = arith.constant 0 : index
    %c0_0 = arith.constant 0 : index
    %c0_1 = arith.constant 0 : index
    %0 = vector.load %arg1[%c0, %c0_0, %c0_1] : memref<1x4x256xf32, #tpu.memory_space<vmem>>, vector<1x4x256xf32>
    %1 = vector.shape_cast %0 : vector<1x4x256xf32> to vector<4x256xf32>
    %c0_2 = arith.constant 0 : index
    %c0_3 = arith.constant 0 : index
    %2 = vector.load %arg2[%c0_2, %c0_3] : memref<8x4xf32, #tpu.memory_space<vmem>>, vector<8x4xf32>
    %cst = arith.constant dense<0.000000e+00> : vector<8x256xf32>
    %3 = tpu.matmul %2, %1, %cst {dimension_numbers = #tpu.dot_dimension_numbers<[1], [0], [0], [1], [0, 0, 1, 1], [], []>} : vector<8x4xf32>, vector<4x256xf32>, vector<8x256xf32> -> vector<8x256xf32>
    %c0_4 = arith.constant 0 : index
    %c0_5 = arith.constant 0 : index
    %4 = vector.load %arg5[%c0_4, %c0_5] : memref<8x1xf32, #tpu.memory_space<vmem>>, vector<8x1xf32>
    %5 = vector.broadcast %4 : vector<8x1xf32> to vector<8x256xf32>
    %6 = arith.mulf %3, %5 : vector<8x256xf32>
    %c0_6 = arith.constant 0 : index
    %c0_7 = arith.constant 0 : index
    %7 = vector.load %arg6[%c0_6, %c0_7] : memref<8x1xf32, #tpu.memory_space<vmem>>, vector<8x1xf32>
    %8 = vector.broadcast %7 : vector<8x1xf32> to vector<8x256xf32>
    %9 = arith.addf %6, %8 : vector<8x256xf32>
    %cst_8 = arith.constant 0.000000e+00 : f32
    %10 = vector.broadcast %cst_8 : f32 to vector<8x256xf32>
    %11 = arith.maximumf %9, %10 : vector<8x256xf32>
    %c17_i32 = arith.constant 17 : i32
    %12 = tpu.dynamic_rotate %11 by %c17_i32 dim 1 : vector<8x256xf32>, i32 -> vector<8x256xf32>
    %c0_9 = arith.constant 0 : index
    %c0_10 = arith.constant 0 : index
    %13 = vector.load %arg4[%c0_9, %c0_10] : memref<9x256xf32, #tpu.memory_space<vmem>>, vector<1x256xf32>
    %14 = vector.broadcast %13 : vector<1x256xf32> to vector<8x256xf32>
    %15 = arith.mulf %12, %14 : vector<8x256xf32>
    %c0_11 = arith.constant 0 : index
    %c0_12 = arith.constant 0 : index
    %c0_13 = arith.constant 0 : index
    %16 = vector.load %arg3[%c0_11, %c0_12, %c0_13] : memref<9x8x8xf32, #tpu.memory_space<vmem>>, vector<1x8x8xf32>
    %17 = vector.shape_cast %16 : vector<1x8x8xf32> to vector<8x8xf32>
    %cst_14 = arith.constant dense<0.000000e+00> : vector<8x256xf32>
    %18 = tpu.matmul %17, %15, %cst_14 {dimension_numbers = #tpu.dot_dimension_numbers<[1], [0], [0], [1], [0, 0, 1, 1], [], []>} : vector<8x8xf32>, vector<8x256xf32>, vector<8x256xf32> -> vector<8x256xf32>
    %c16_i32 = arith.constant 16 : i32
    %19 = tpu.dynamic_rotate %11 by %c16_i32 dim 1 : vector<8x256xf32>, i32 -> vector<8x256xf32>
    %c1 = arith.constant 1 : index
    %c0_15 = arith.constant 0 : index
    %20 = vector.load %arg4[%c1, %c0_15] : memref<9x256xf32, #tpu.memory_space<vmem>>, vector<1x256xf32>
    %21 = vector.broadcast %20 : vector<1x256xf32> to vector<8x256xf32>
    %22 = arith.mulf %19, %21 : vector<8x256xf32>
    %c1_16 = arith.constant 1 : index
    %c0_17 = arith.constant 0 : index
    %c0_18 = arith.constant 0 : index
    %23 = vector.load %arg3[%c1_16, %c0_17, %c0_18] : memref<9x8x8xf32, #tpu.memory_space<vmem>>, vector<1x8x8xf32>
    %24 = vector.shape_cast %23 : vector<1x8x8xf32> to vector<8x8xf32>
    %cst_19 = arith.constant dense<0.000000e+00> : vector<8x256xf32>
    %25 = tpu.matmul %24, %22, %cst_19 {dimension_numbers = #tpu.dot_dimension_numbers<[1], [0], [0], [1], [0, 0, 1, 1], [], []>} : vector<8x8xf32>, vector<8x256xf32>, vector<8x256xf32> -> vector<8x256xf32>
    %26 = arith.addf %18, %25 : vector<8x256xf32>
    %c15_i32 = arith.constant 15 : i32
    %27 = tpu.dynamic_rotate %11 by %c15_i32 dim 1 : vector<8x256xf32>, i32 -> vector<8x256xf32>
    %c2 = arith.constant 2 : index
    %c0_20 = arith.constant 0 : index
    %28 = vector.load %arg4[%c2, %c0_20] : memref<9x256xf32, #tpu.memory_space<vmem>>, vector<1x256xf32>
    %29 = vector.broadcast %28 : vector<1x256xf32> to vector<8x256xf32>
    %30 = arith.mulf %27, %29 : vector<8x256xf32>
    %c2_21 = arith.constant 2 : index
    %c0_22 = arith.constant 0 : index
    %c0_23 = arith.constant 0 : index
    %31 = vector.load %arg3[%c2_21, %c0_22, %c0_23] : memref<9x8x8xf32, #tpu.memory_space<vmem>>, vector<1x8x8xf32>
    %32 = vector.shape_cast %31 : vector<1x8x8xf32> to vector<8x8xf32>
    %cst_24 = arith.constant dense<0.000000e+00> : vector<8x256xf32>
    %33 = tpu.matmul %32, %30, %cst_24 {dimension_numbers = #tpu.dot_dimension_numbers<[1], [0], [0], [1], [0, 0, 1, 1], [], []>} : vector<8x8xf32>, vector<8x256xf32>, vector<8x256xf32> -> vector<8x256xf32>
    %34 = arith.addf %26, %33 : vector<8x256xf32>
    %c1_i32 = arith.constant 1 : i32
    %35 = tpu.dynamic_rotate %11 by %c1_i32 dim 1 : vector<8x256xf32>, i32 -> vector<8x256xf32>
    %c3 = arith.constant 3 : index
    %c0_25 = arith.constant 0 : index
    %36 = vector.load %arg4[%c3, %c0_25] : memref<9x256xf32, #tpu.memory_space<vmem>>, vector<1x256xf32>
    %37 = vector.broadcast %36 : vector<1x256xf32> to vector<8x256xf32>
    %38 = arith.mulf %35, %37 : vector<8x256xf32>
    %c3_26 = arith.constant 3 : index
    %c0_27 = arith.constant 0 : index
    %c0_28 = arith.constant 0 : index
    %39 = vector.load %arg3[%c3_26, %c0_27, %c0_28] : memref<9x8x8xf32, #tpu.memory_space<vmem>>, vector<1x8x8xf32>
    %40 = vector.shape_cast %39 : vector<1x8x8xf32> to vector<8x8xf32>
    %cst_29 = arith.constant dense<0.000000e+00> : vector<8x256xf32>
    %41 = tpu.matmul %40, %38, %cst_29 {dimension_numbers = #tpu.dot_dimension_numbers<[1], [0], [0], [1], [0, 0, 1, 1], [], []>} : vector<8x8xf32>, vector<8x256xf32>, vector<8x256xf32> -> vector<8x256xf32>
    %42 = arith.addf %34, %41 : vector<8x256xf32>
    %c4 = arith.constant 4 : index
    %c0_30 = arith.constant 0 : index
    %c0_31 = arith.constant 0 : index
    %43 = vector.load %arg3[%c4, %c0_30, %c0_31] : memref<9x8x8xf32, #tpu.memory_space<vmem>>, vector<1x8x8xf32>
    %44 = vector.shape_cast %43 : vector<1x8x8xf32> to vector<8x8xf32>
    %cst_32 = arith.constant dense<0.000000e+00> : vector<8x256xf32>
    %45 = tpu.matmul %44, %11, %cst_32 {dimension_numbers = #tpu.dot_dimension_numbers<[1], [0], [0], [1], [0, 0, 1, 1], [], []>} : vector<8x8xf32>, vector<8x256xf32>, vector<8x256xf32> -> vector<8x256xf32>
    %46 = arith.addf %42, %45 : vector<8x256xf32>
    %c255_i32 = arith.constant 255 : i32
    %47 = tpu.dynamic_rotate %11 by %c255_i32 dim 1 : vector<8x256xf32>, i32 -> vector<8x256xf32>
    %c5 = arith.constant 5 : index
    %c0_33 = arith.constant 0 : index
    %48 = vector.load %arg4[%c5, %c0_33] : memref<9x256xf32, #tpu.memory_space<vmem>>, vector<1x256xf32>
    %49 = vector.broadcast %48 : vector<1x256xf32> to vector<8x256xf32>
    %50 = arith.mulf %47, %49 : vector<8x256xf32>
    %c5_34 = arith.constant 5 : index
    %c0_35 = arith.constant 0 : index
    %c0_36 = arith.constant 0 : index
    %51 = vector.load %arg3[%c5_34, %c0_35, %c0_36] : memref<9x8x8xf32, #tpu.memory_space<vmem>>, vector<1x8x8xf32>
    %52 = vector.shape_cast %51 : vector<1x8x8xf32> to vector<8x8xf32>
    %cst_37 = arith.constant dense<0.000000e+00> : vector<8x256xf32>
    %53 = tpu.matmul %52, %50, %cst_37 {dimension_numbers = #tpu.dot_dimension_numbers<[1], [0], [0], [1], [0, 0, 1, 1], [], []>} : vector<8x8xf32>, vector<8x256xf32>, vector<8x256xf32> -> vector<8x256xf32>
    %54 = arith.addf %46, %53 : vector<8x256xf32>
    %c241_i32 = arith.constant 241 : i32
    %55 = tpu.dynamic_rotate %11 by %c241_i32 dim 1 : vector<8x256xf32>, i32 -> vector<8x256xf32>
    %c6 = arith.constant 6 : index
    %c0_38 = arith.constant 0 : index
    %56 = vector.load %arg4[%c6, %c0_38] : memref<9x256xf32, #tpu.memory_space<vmem>>, vector<1x256xf32>
    %57 = vector.broadcast %56 : vector<1x256xf32> to vector<8x256xf32>
    %58 = arith.mulf %55, %57 : vector<8x256xf32>
    %c6_39 = arith.constant 6 : index
    %c0_40 = arith.constant 0 : index
    %c0_41 = arith.constant 0 : index
    %59 = vector.load %arg3[%c6_39, %c0_40, %c0_41] : memref<9x8x8xf32, #tpu.memory_space<vmem>>, vector<1x8x8xf32>
    %60 = vector.shape_cast %59 : vector<1x8x8xf32> to vector<8x8xf32>
    %cst_42 = arith.constant dense<0.000000e+00> : vector<8x256xf32>
    %61 = tpu.matmul %60, %58, %cst_42 {dimension_numbers = #tpu.dot_dimension_numbers<[1], [0], [0], [1], [0, 0, 1, 1], [], []>} : vector<8x8xf32>, vector<8x256xf32>, vector<8x256xf32> -> vector<8x256xf32>
    %62 = arith.addf %54, %61 : vector<8x256xf32>
    %c240_i32 = arith.constant 240 : i32
    %63 = tpu.dynamic_rotate %11 by %c240_i32 dim 1 : vector<8x256xf32>, i32 -> vector<8x256xf32>
    %c7 = arith.constant 7 : index
    %c0_43 = arith.constant 0 : index
    %64 = vector.load %arg4[%c7, %c0_43] : memref<9x256xf32, #tpu.memory_space<vmem>>, vector<1x256xf32>
    %65 = vector.broadcast %64 : vector<1x256xf32> to vector<8x256xf32>
    %66 = arith.mulf %63, %65 : vector<8x256xf32>
    %c7_44 = arith.constant 7 : index
    %c0_45 = arith.constant 0 : index
    %c0_46 = arith.constant 0 : index
    %67 = vector.load %arg3[%c7_44, %c0_45, %c0_46] : memref<9x8x8xf32, #tpu.memory_space<vmem>>, vector<1x8x8xf32>
    %68 = vector.shape_cast %67 : vector<1x8x8xf32> to vector<8x8xf32>
    %cst_47 = arith.constant dense<0.000000e+00> : vector<8x256xf32>
    %69 = tpu.matmul %68, %66, %cst_47 {dimension_numbers = #tpu.dot_dimension_numbers<[1], [0], [0], [1], [0, 0, 1, 1], [], []>} : vector<8x8xf32>, vector<8x256xf32>, vector<8x256xf32> -> vector<8x256xf32>
    %70 = arith.addf %62, %69 : vector<8x256xf32>
    %c239_i32 = arith.constant 239 : i32
    %71 = tpu.dynamic_rotate %11 by %c239_i32 dim 1 : vector<8x256xf32>, i32 -> vector<8x256xf32>
    %c8 = arith.constant 8 : index
    %c0_48 = arith.constant 0 : index
    %72 = vector.load %arg4[%c8, %c0_48] : memref<9x256xf32, #tpu.memory_space<vmem>>, vector<1x256xf32>
    %73 = vector.broadcast %72 : vector<1x256xf32> to vector<8x256xf32>
    %74 = arith.mulf %71, %73 : vector<8x256xf32>
    %c8_49 = arith.constant 8 : index
    %c0_50 = arith.constant 0 : index
    %c0_51 = arith.constant 0 : index
    %75 = vector.load %arg3[%c8_49, %c0_50, %c0_51] : memref<9x8x8xf32, #tpu.memory_space<vmem>>, vector<1x8x8xf32>
    %76 = vector.shape_cast %75 : vector<1x8x8xf32> to vector<8x8xf32>
    %cst_52 = arith.constant dense<0.000000e+00> : vector<8x256xf32>
    %77 = tpu.matmul %76, %74, %cst_52 {dimension_numbers = #tpu.dot_dimension_numbers<[1], [0], [0], [1], [0, 0, 1, 1], [], []>} : vector<8x8xf32>, vector<8x256xf32>, vector<8x256xf32> -> vector<8x256xf32>
    %78 = arith.addf %70, %77 : vector<8x256xf32>
    %c0_53 = arith.constant 0 : index
    %c0_54 = arith.constant 0 : index
    %c0_55 = arith.constant 0 : index
    %79 = vector.load %arg7[%c0_53, %c0_54, %c0_55] : memref<1x8x256xf32, #tpu.memory_space<vmem>>, vector<1x8x256xf32>
    %80 = vector.shape_cast %79 : vector<1x8x256xf32> to vector<8x256xf32>
    %81 = vector.shape_cast %78 : vector<8x256xf32> to vector<1x8x256xf32>
    tpu.vector_store %arg7[%c0_53, %c0_54, %c0_55], %81 {strides = array<i32>} : memref<1x8x256xf32, #tpu.memory_space<vmem>>, vector<1x8x256xf32>,
    %cst_56 = arith.constant dense<0.000000e+00> : vector<8xf32>
    %82 = vector.multi_reduction <add>, %78, %cst_56 [1] : vector<8x256xf32> to vector<8xf32>
    %83 = vector.shape_cast %82 : vector<8xf32> to vector<8x1xf32>
    %c0_57 = arith.constant 0 : index
    %c0_58 = arith.constant 0 : index
    %c0_59 = arith.constant 0 : index
    %84 = vector.load %arg8[%c0_57, %c0_58, %c0_59] : memref<1x8x1xf32, #tpu.memory_space<vmem>>, vector<1x8x1xf32>
    %85 = vector.shape_cast %84 : vector<1x8x1xf32> to vector<8x1xf32>
    %86 = vector.shape_cast %83 : vector<8x1xf32> to vector<1x8x1xf32>
    tpu.vector_store %arg8[%c0_57, %c0_58, %c0_59], %86 {strides = array<i32>} : memref<1x8x1xf32, #tpu.memory_space<vmem>>, vector<1x8x1xf32>,
    %87 = arith.mulf %78, %78 : vector<8x256xf32>
    %cst_60 = arith.constant dense<0.000000e+00> : vector<8xf32>
    %88 = vector.multi_reduction <add>, %87, %cst_60 [1] : vector<8x256xf32> to vector<8xf32>
    %89 = vector.shape_cast %88 : vector<8xf32> to vector<8x1xf32>
    %c0_61 = arith.constant 0 : index
    %c0_62 = arith.constant 0 : index
    %c0_63 = arith.constant 0 : index
    %90 = vector.load %arg9[%c0_61, %c0_62, %c0_63] : memref<1x8x1xf32, #tpu.memory_space<vmem>>, vector<1x8x1xf32>
    %91 = vector.shape_cast %90 : vector<1x8x1xf32> to vector<8x1xf32>
    %92 = vector.shape_cast %89 : vector<8x1xf32> to vector<1x8x1xf32>
    tpu.vector_store %arg9[%c0_61, %c0_62, %c0_63], %92 {strides = array<i32>} : memref<1x8x1xf32, #tpu.memory_space<vmem>>, vector<1x8x1xf32>,
    return
  }
  func.func @transform_0(%arg0: i32) -> (i32, i32, i32) {
    %c0_i32 = arith.constant 0 : i32
    %c0_i32_0 = arith.constant 0 : i32
    %c0_i32_1 = arith.constant 0 : i32
    return %arg0, %c0_i32, %c0_i32_0 : i32, i32, i32
  }
  func.func @transform_1(%arg0: i32) -> (i32, i32) {
    %c0_i32 = arith.constant 0 : i32
    %c0_i32_0 = arith.constant 0 : i32
    %c0_i32_1 = arith.constant 0 : i32
    return %c0_i32, %c0_i32_0 : i32, i32
  }
  func.func @transform_2(%arg0: i32) -> (i32, i32, i32) {
    %c0_i32 = arith.constant 0 : i32
    %c0_i32_0 = arith.constant 0 : i32
    %c0_i32_1 = arith.constant 0 : i32
    %c0_i32_2 = arith.constant 0 : i32
    return %c0_i32, %c0_i32_0, %c0_i32_1 : i32, i32, i32
  }
  func.func @transform_3(%arg0: i32) -> (i32, i32) {
    %c0_i32 = arith.constant 0 : i32
    %c0_i32_0 = arith.constant 0 : i32
    %c0_i32_1 = arith.constant 0 : i32
    return %c0_i32, %c0_i32_0 : i32, i32
  }
  func.func @transform_4(%arg0: i32) -> (i32, i32) {
    %c0_i32 = arith.constant 0 : i32
    %c0_i32_0 = arith.constant 0 : i32
    %c0_i32_1 = arith.constant 0 : i32
    return %c0_i32, %c0_i32_0 : i32, i32
  }
  func.func @transform_5(%arg0: i32) -> (i32, i32) {
    %c0_i32 = arith.constant 0 : i32
    %c0_i32_0 = arith.constant 0 : i32
    %c0_i32_1 = arith.constant 0 : i32
    return %c0_i32, %c0_i32_0 : i32, i32
  }
  func.func @transform_6(%arg0: i32) -> (i32, i32, i32) {
    %c0_i32 = arith.constant 0 : i32
    %c0_i32_0 = arith.constant 0 : i32
    %c0_i32_1 = arith.constant 0 : i32
    return %arg0, %c0_i32, %c0_i32_0 : i32, i32, i32
  }
  func.func @transform_7(%arg0: i32) -> (i32, i32, i32) {
    %c0_i32 = arith.constant 0 : i32
    %c0_i32_0 = arith.constant 0 : i32
    %c0_i32_1 = arith.constant 0 : i32
    return %arg0, %c0_i32, %c0_i32_0 : i32, i32, i32
  }
  func.func @transform_8(%arg0: i32) -> (i32, i32, i32) {
    %c0_i32 = arith.constant 0 : i32
    %c0_i32_0 = arith.constant 0 : i32
    %c0_i32_1 = arith.constant 0 : i32
    return %arg0, %c0_i32, %c0_i32_0 : i32, i32, i32
  }
}

</mosaic_0001>

<bundles_post_ra>
// kernel: simple_block.5
= control target key start
LH: loop header
LB: loop body
LE: loop exit
PB: predicated region body
PF: predicated region fallthrough
CT: control target
= control target key end

     0   :  { %s300_s12 = smov 0   ;;  %s323_s0 = inlined_call_operand.vmem [shape: f32[2,8,256], index: 0, kind: input, shape index: {}]   ;;  %s324_s1 = inlined_call_operand.vmem [shape: f32[8,1], index: 1, kind: input, shape index: {}]   ;;  %s325_s2 = inlined_call_operand.vmem [shape: f32[8,1], index: 2, kind: input, shape index: {}]   ;;  %s326_s3 = inlined_call_operand.vmem [shape: f32[2,8,256], index: 3, kind: output, shape index: {}]  }
   0x1 LB: > { %s248_s13 = sadd.s32 4294967295, %s277_s12   ;;  %p252_p0 = scmp.ge.s32.totalorder %s277_s12, 1  ;;  %s277_s12 = sphi %s300_s12, %s13_s12  }
   0x2   : > { %p137_p1 = scmp.lt.s32.totalorder %s277_s12, 3 }
   0x4   : > { %p138_p2 = pnand %p252_p0, %p137_p1 }
   0x5   : > { %p161_p3 = scmp.lt.s32.totalorder (!%p138_p2), %s248_s13, 1 }
   0x6   : > { %141 = sbr.rel (%p138_p2) target bundleno = 146 (0x92), region = 32 }
   0xb   : > { %v173_v0 = vld [vmem:[%s324_s1] sm:$0xff]  ;;  %v279_v1 = vmov 0   ;;  %s328_s13 = smov (!%p161_p3, %s248_s13), 1 }
   0xc   : > { %270 = vset.pattern.permute.xlu0 %v279_v1  ;;  %v181_v2 = vld [vmem:[%s325_s2] sm:$0xff]  ;;  %s259_s18 = sshll.u32 %s328_s13, 4 }
   0xd   : > { %176 = vperm.xlu0 %270, %v173_v0   ;;  %s165_s21 = scalar_lea.vmem %s323_s0, %s259_s18  ;;  %s170_s24 = scalar_lea.vmem %s326_s3, %s259_s18 }
   0xe   : > { %v171_v4 = vld [vmem:[%s165_s21] sm:$0xff]  ;;  %v172_v5 = vld [vmem:[%s165_s21 + $0x8] sm:$0xff] }
  0x11   : > { %184 = vperm.xlu0 %270, %v181_v2  }
  0x88   : > { %v177_v3 = vpop.permute.xlu0 %176 }
  0x89   : > { %v179_v6 = vmul.f32 %v177_v3, %v171_v4  ;;  %v180_v7 = vmul.f32 %v177_v3, %v172_v5 }
  0x8c   : > { %v185_v8 = vpop.permute.xlu0 %184 }
  0x8d   : > { %v187_v9 = vadd.f32 %v185_v8, %v179_v6  ;;  %v188_v10 = vadd.f32 %v185_v8, %v180_v7 }
  0x8f   : > { %v189_v11 = vmax.f32 %v187_v9, 0.0  ;;  %v190_v12 = vmax.f32 %v188_v10, 0.0 }
  0x91   : > { %191 = vst [vmem:[%s170_s24] sm:$0xff] %v189_v11  ;;  %192 = vst [vmem:[%s170_s24 + $0x8] sm:$0xff] %v190_v12 }
  0x92 PF: > { %s13_s12 = sadd.s32 1, %s277_s12  }
  0x93   : > { %p10_p4 = scmp.ge.s32.totalorder %s13_s12, 4  }
  0x95   :  { %12 = sbr.rel (!%p10_p4) target bundleno = 1 (0x1), region = 62 }

// kernel: simple_block.3
= control target key start
LH: loop header
LB: loop body
LE: loop exit
PB: predicated region body
PF: predicated region fallthrough
CT: control target
= control target key end

     0   :  { %s413_s12 = smov 0   ;;  %s436_s0 = inlined_call_operand.vmem [shape: f32[2,4,256], index: 0, kind: input, shape index: {}]   ;;  %s437_s1 = inlined_call_operand.vmem [shape: f32[8,4], index: 1, kind: input, shape index: {}]   ;;  %s438_s2 = inlined_call_operand.vmem [shape: f32[2,8,1], index: 2, kind: output, shape index: {0}]   ;;  %s439_s3 = inlined_call_operand.vmem [shape: f32[2,8,1], index: 3, kind: output, shape index: {1}]  }
   0x1 LB: > { %s359_s13 = sadd.s32 4294967295, %s390_s12   ;;  %p363_p0 = scmp.ge.s32.totalorder %s390_s12, 1  ;;  %s390_s12 = sphi %s413_s12, %s14_s12  }
   0x2   : > { %p140_p1 = scmp.lt.s32.totalorder %s390_s12, 3 }
   0x4   : > { %p141_p2 = pnand %p363_p0, %p140_p1 }
   0x5   : > { %p167_p3 = scmp.lt.s32.totalorder (!%p141_p2), %s359_s13, 1 }
   0x6   : > { %144 = sbr.rel (%p141_p2) target bundleno = 359 (0x167), region = 28 }
   0xb   : > { %v392_v0 = vmov 0.0   ;;  %s441_s13 = smov (!%p167_p3, %s359_s13), 1  ;;  %vm188_vm0 = vcmask 1043456   ;;  %v181_v3 = vld [vmem:[%s437_s1] sm:$0xff]  ;;  %vm184_vm1 = vcmask 31744   ;;  %vm267_vm2 = vcmask 7168  }
   0xc   : > { %257 = vmatprep.mubr.f32.mxu0 %v392_v0  ;;  %s373_s14 = sshll.u32 %s441_s13, 3 }
   0xd   : > { %s171_s17 = scalar_lea.vmem %s436_s0, %s373_s14  ;;  %s175_s22 = scalar_lea.vmem %s438_s2, %s373_s14 }
   0xe   : > { %v180_v1 = vld [vmem:[%s171_s17] sm:$0xff]  ;;  %s179_s25 = scalar_lea.vmem %s439_s3, %s373_s14 }
   0xf   : > { %v183_v2 = vcombine.high %v180_v1, %v180_v1 }
  0x11   : > { %368 = vmatprep.subr.msk.mxu0 %vm188_vm0, %v183_v2 }
  0x12   : > { %369 = vmatpush1.msk.msra.mxu0 %vm188_vm0, %v180_v1 }
  0x13   : > { %370 = vmatmul.mubr.msk.f32.vlgmr.msra.gmra.mxu0 %vm184_vm1, %v181_v3 }
  0xd3   : > { %v259_v4 = vpop.f32.mrf.mxu0 }
  0xd4   : > { %v269_v8 = vmul.f32 %v259_v4, %v259_v4 }
  0xd5   : > { %v261_v5 = vpop.f32.mrf.mxu0 }
  0xd6   : > { %v270_v6 = vmul.f32 %v261_v5, %v261_v5  ;;  %v264_v7 = vadd.f32 %v261_v5, %v259_v4 }
  0xd8   : > { %265 = vadd.xlane.f32.xlu0 %v264_v7  ;;  %v271_v9 = vadd.f32 %v270_v6, %v269_v8 }
  0xdc   : > { %272 = vadd.xlane.f32.xlu0 %v271_v9 }
 0x161   : > { %v266_v10 = vpop.xlane.xlu0 %265 }
 0x162   : > { %268 = vst.msk [vmem:[%s175_s22] sm:$0xff] %vm267_vm2, %v266_v10 }
 0x165   : > { %v273_v11 = vpop.xlane.xlu0 %272 }
 0x166   : > { %274 = vst.msk [vmem:[%s179_s25] sm:$0xff] %vm267_vm2, %v273_v11 }
 0x167 PF: > { %s14_s12 = sadd.s32 1, %s390_s12  }
 0x168   : > { %p11_p4 = scmp.ge.s32.totalorder %s14_s12, 4  }
 0x16a   :  { %13 = sbr.rel (!%p11_p4) target bundleno = 1 (0x1), region = 70 }

// kernel: simple_block.4
= control target key start
LH: loop header
LB: loop body
LE: loop exit
PB: predicated region body
PF: predicated region fallthrough
CT: control target
= control target key end

     0   :  { %s1559_s27 = smov 0   ;;  %s1722_s0 = inlined_call_operand.vmem [shape: f32[2,4,256], index: 0, kind: input, shape index: {}]   ;;  %s1723_s1 = inlined_call_operand.vmem [shape: f32[8,4], index: 1, kind: input, shape index: {}]   ;;  %s1724_s2 = inlined_call_operand.vmem [shape: f32[9,8,8], index: 2, kind: input, shape index: {}]   ;;  %s1725_s3 = inlined_call_operand.vmem [shape: f32[9,256], index: 3, kind: input, shape index: {}]   ;;  %s1726_s4 = inlined_call_operand.vmem [shape: f32[8,1], index: 4, kind: input, shape index: {}]   ;;  %s1727_s5 = inlined_call_operand.vmem [shape: f32[8,1], index: 5, kind: input, shape index: {}]   ;;  %s1728_s6 = inlined_call_operand.vmem [shape: f32[2,8,256], index: 6, kind: output, shape index: {0}]   ;;  %s1729_s7 = inlined_call_operand.vmem [shape: f32[2,8,1], index: 7, kind: output, shape index: {1}]   ;;  %s1730_s8 = inlined_call_operand.vmem [shape: f32[2,8,1], index: 8, kind: output, shape index: {2}]  }
   0x1 LB: > { %s1434_s28 = sadd.s32 4294967295, %s1502_s27   ;;  %p1438_p0 = scmp.ge.s32.totalorder %s1502_s27, 1  ;;  %s1502_s27 = sphi %s1559_s27, %s19_s27  }
   0x2   : > { %p267_p1 = scmp.lt.s32.totalorder %s1502_s27, 3 }
   0x4   : > { %p268_p2 = pnand %p1438_p0, %p267_p1 }
   0x5   : > { %p309_p3 = scmp.lt.s32.totalorder (!%p268_p2), %s1434_s28, 1  ;;  %s1506_s17 = smov (!%p268_p2), 17  }
   0x6   : > { %271 = sbr.rel (%p268_p2) target bundleno = 710 (0x2c6), region = 44  ;;  %s1507_s18 = smov (!%p268_p2), 16  }
   0x7   : > { %s1508_s19 = smov (!%p268_p2), 15   ;;  %s1509_s20 = smov (!%p268_p2), 1  }
   0x8   : > { %s1510_s21 = smov (!%p268_p2), 127   ;;  %s1511_s22 = smov (!%p268_p2), 113  }
   0x9   : > { %s1512_s23 = smov (!%p268_p2), 112   ;;  %s1513_s24 = smov (!%p268_p2), 111  }
   0xb   : > { %v1504_v0 = vmov 0.0   ;;  %v1505_v1 = vmov 0   ;;  %v411_v2 = vld [vmem:[%s1726_s4] sm:$0xff]  ;;  %s1732_s28 = smov (!%p309_p3, %s1434_s28), 1  ;;  %vm335_vm0 = vcmask 1043456   ;;  %vm331_vm1 = vcmask 31744  }
   0xc   : > { %404 = vmatprep.mubr.f32.mxu0 %v1504_v0  ;;  %1494 = vset.pattern.permute.xlu0 %v1505_v1  ;;  %v419_v3 = vld [vmem:[%s1727_s5] sm:$0xff]  ;;  %s1578_s11 = sshll.u32 %s1732_s28, 3  ;;  %v433_v17 = vlaneseq  ;;  %v1449_v37 = vld [vmem:[%s1724_s2 + $0x8] sm:$0xff]  ;;  %vm477_vm4 = vcmask 64512   ;;  %v1453_v57 = vld [vmem:[%s1724_s2 + $0x10] sm:$0xff]  ;;  %vm1309_vm11 = vcmask 7168  }
   0xd   : > { %414 = vperm.xlu0 %1494, %v411_v2   ;;  %545 = vmatprep.mubr.f32.mxu1 %v1504_v0  ;;  %s313_s14 = scalar_lea.vmem %s1722_s0, %s1578_s11  ;;  %v328_v6 = vld [vmem:[%s1723_s1] sm:$0xff]  ;;  %s322_s26 = scalar_lea.vmem %s1729_s7, %s1578_s11 }
   0xe   : > { %v327_v4 = vld [vmem:[%s313_s14] sm:$0xff]  ;;  %v441_v18 = vshrl.u32 %v433_v17, 7  ;;  %v1608_v19 = vand.u32 127, %v433_v17  ;;  %s326_s9 = scalar_lea.vmem %s1730_s8, %s1578_s11 }
   0xf   : > { %v330_v5 = vcombine.high %v327_v4, %v327_v4  ;;  %v1448_v22 = vld [vmem:[%s1725_s3 + $0x1] ss:$8 sm:$0x3]  ;;  %v438_v27 = vld [vmem:[%s1725_s3] ss:$8 sm:$0x3] }
  0x10   : > { %v1610_v20 = vsub.s32 1, %v441_v18  ;;  %v1612_v21 = vsub.s32 0, %v441_v18  ;;  %vm457_vm2 = vcmp.lt.s32.totalorder %v1608_v19, 16  ;;  %vm435_vm3 = vcmp.lt.s32.totalorder %v1608_v19, 17  ;;  %v452_v47 = vld [vmem:[%s1724_s2] sm:$0xff] }
  0x11   : > { %422 = vperm.xlu0 %1494, %v419_v3   ;;  %1445 = vmatprep.subr.msk.mxu0 %vm335_vm0, %v330_v5  ;;  %v1452_v36 = vld [vmem:[%s1725_s3 + $0x2] ss:$8 sm:$0x3]  ;;  %vm630_vm5 = vcmp.lt.s32.totalorder %v1608_v19, 15  ;;  %vm730_vm6 = vcmp.lt.s32.totalorder %v1608_v19, 1  ;;  %vm908_vm7 = vcmp.lt.s32.totalorder %v1608_v19, 127 }
  0x12   : > { %1446 = vmatpush1.msk.msra.mxu0 %vm335_vm0, %v327_v4  ;;  %v470_v25 = vrot.slane %v1448_v22, %v1610_v20  ;;  %v466_v26 = vrot.slane %v1448_v22, %v1612_v21  ;;  %v443_v33 = vrot.slane %v438_v27, %v1612_v21  ;;  %v447_v34 = vrot.slane %v438_v27, %v1610_v20  ;;  %v1455_v46 = vld [vmem:[%s1725_s3 + $0x3] ss:$8 sm:$0x3]  ;;  %v1460_v56 = vld [vmem:[%s1725_s3 + $0x5] ss:$8 sm:$0x3] }
  0x13   : > { %1447 = vmatmul.mubr.msk.f32.vlgmr.msra.gmra.mxu0 %vm331_vm1, %v328_v6  ;;  %v639_v44 = vrot.slane %v1452_v36, %v1612_v21  ;;  %v643_v45 = vrot.slane %v1452_v36, %v1610_v20  ;;  %v739_v54 = vrot.slane %v1455_v46, %v1612_v21  ;;  %v743_v55 = vrot.slane %v1455_v46, %v1610_v20  ;;  %v1463_v2 = vld [vmem:[%s1725_s3 + $0x6] ss:$8 sm:$0x3]  ;;  %v1456_v3 = vld [vmem:[%s1724_s2 + $0x18] sm:$0xff]  ;;  %v1464_v27 = vld [vmem:[%s1724_s2 + $0x30] sm:$0xff] }
  0x14   : > { %619 = vmatprep.mubr.f32.mxu0 %v1504_v0  ;;  %v917_v61 = vrot.slane %v1460_v56, %v1612_v21  ;;  %v921_v1 = vrot.slane %v1460_v56, %v1610_v20  ;;  %v1458_v4 = vld [vmem:[%s1724_s2 + $0x20] sm:$0xff]  ;;  %vm1008_vm8 = vcmp.lt.s32.totalorder %v1608_v19, 113  ;;  %vm1108_vm9 = vcmp.lt.s32.totalorder %v1608_v19, 112 }
  0x15   : > { %vm1208_vm10 = vcmp.lt.s32.totalorder %v1608_v19, 111 }
  0x88   : > { %v415_v7 = vpop.permute.xlu0 %414 }
  0x8c   : > { %v423_v10 = vpop.permute.xlu0 %422 }
  0xd3   : > { %v406_v8 = vpop.f32.mrf.mxu0 }
  0xd4   : > { %v417_v9 = vmul.f32 %v415_v7, %v406_v8 }
  0xd5   : > { %v408_v11 = vpop.f32.mrf.mxu0 }
  0xd6   : > { %v425_v12 = vadd.f32 %v423_v10, %v417_v9  ;;  %v418_v13 = vmul.f32 %v415_v7, %v408_v11  ;;  %v1017_v9 = vrot.slane %v1463_v2, %v1612_v21 }
  0xd8   : > { %v1588_v14 = vmax.f32 %v425_v12, 0.0  ;;  %v426_v15 = vadd.f32 %v423_v10, %v418_v13  ;;  %v1021_v12 = vrot.slane %v1463_v2, %v1610_v20  ;;  %v1466_v13 = vld [vmem:[%s1725_s3 + $0x7] ss:$8 sm:$0x3] }
  0xda   : > { %429 = vrot.lane.b32.xlu0 %v1588_v14, %s1506_s17  ;;  %453 = vrot.lane.b32.xlu1 %v1588_v14, %s1507_s18  ;;  %v1592_v16 = vmax.f32 %v426_v15, 0.0 }
  0xde   : > { %626 = vrot.lane.b32.xlu0 %v1588_v14, %s1508_s19  ;;  %455 = vrot.lane.b32.xlu1 %v1592_v16, %s1507_s18 }
  0xe2   : > { %726 = vrot.lane.b32.xlu0 %v1588_v14, %s1509_s20  ;;  %431 = vrot.lane.b32.xlu1 %v1592_v16, %s1506_s17 }
  0xe6   : > { %904 = vrot.lane.b32.xlu0 %v1588_v14, %s1510_s21  ;;  %628 = vrot.lane.b32.xlu1 %v1592_v16, %s1508_s19 }
  0xea   : > { %1004 = vrot.lane.b32.xlu0 %v1588_v14, %s1511_s22  ;;  %728 = vrot.lane.b32.xlu1 %v1592_v16, %s1509_s20 }
  0xee   : > { %1104 = vrot.lane.b32.xlu0 %v1588_v14, %s1512_s23  ;;  %906 = vrot.lane.b32.xlu1 %v1592_v16, %s1510_s21  ;;  %s1475_s21 = sshll.u32 %s1732_s28, 4 }
  0xf2   : > { %1204 = vrot.lane.b32.xlu0 %v1588_v14, %s1513_s24  ;;  %1006 = vrot.lane.b32.xlu1 %v1592_v16, %s1511_s22 }
  0xf6   : > { %1106 = vrot.lane.b32.xlu1 %v1592_v16, %s1512_s23 }
  0xfa   : > { %1206 = vrot.lane.b32.xlu1 %v1592_v16, %s1513_s24  ;;  %s318_s24 = scalar_lea.vmem %s1728_s6, %s1475_s21 }
 0x14c   : > { %v430_v23 = vpop.permute.xlu0 %429  ;;  %v454_v24 = vpop.permute.xlu1 %453 }
 0x150   : > { %v627_v28 = vpop.permute.xlu0 %626  ;;  %v456_v29 = vpop.permute.xlu1 %455 }
 0x151   : > { %v459_v30 = vsel %vm457_vm2, %v456_v29, %v454_v24  ;;  %v458_v31 = vsel %vm457_vm2, %v454_v24, %v456_v29  ;;  %v1117_v24 = vrot.slane %v1466_v13, %v1612_v21 }
 0x152   : > { %v474_v32 = vmul.f32 %v470_v25, %v458_v31  ;;  %v473_v35 = vmul.f32 %v466_v26, %v459_v30  ;;  %v1121_v25 = vrot.slane %v1466_v13, %v1610_v20  ;;  %v1469_v26 = vld [vmem:[%s1725_s3 + $0x10] ss:$8 sm:$0x3] }
 0x154   : > { %v727_v38 = vpop.permute.xlu0 %726  ;;  %511 = vmatprep.subr.mxu1 %v474_v32  ;;  %v432_v39 = vpop.permute.xlu1 %431 }
 0x155   : > { %v436_v40 = vsel %vm435_vm3, %v430_v23, %v432_v39  ;;  %v437_v41 = vsel %vm435_vm3, %v432_v39, %v430_v23  ;;  %512 = vmatpush1.msra.mxu1 %v473_v35  ;;  %v1467_v35 = vld [vmem:[%s1724_s2 + $0x38] sm:$0xff] }
 0x156   : > { %v450_v42 = vmul.f32 %v443_v33, %v437_v41  ;;  %v451_v43 = vmul.f32 %v447_v34, %v436_v40  ;;  %1450 = vmatmul.mubr.msk.f32.vlgmr.msra.gmra.mxu1 %vm477_vm4, %v1449_v37  ;;  %v1217_v33 = vrot.slane %v1469_v26, %v1612_v21  ;;  %v1221_v34 = vrot.slane %v1469_v26, %v1610_v20  ;;  %v1470_v20 = vld [vmem:[%s1724_s2 + $0x40] sm:$0xff] }
 0x157   : > { %717 = vmatprep.mubr.f32.mxu1 %v1504_v0 }
 0x158   : > { %585 = vmatprep.subr.mxu0 %v451_v43  ;;  %v629_v48 = vpop.permute.xlu1 %628  ;;  %v905_v51 = vpop.permute.xlu0 %904 }
 0x159   : > { %v631_v49 = vsel %vm630_vm5, %v627_v28, %v629_v48  ;;  %v632_v50 = vsel %vm630_vm5, %v629_v48, %v627_v28  ;;  %586 = vmatpush1.msra.mxu0 %v450_v42 }
 0x15a   : > { %v646_v52 = vmul.f32 %v639_v44, %v632_v50  ;;  %v647_v53 = vmul.f32 %v643_v45, %v631_v49  ;;  %1451 = vmatmul.mubr.msk.f32.vlgmr.msra.gmra.mxu0 %vm477_vm4, %v452_v47 }
 0x15b   : > { %817 = vmatprep.mubr.f32.mxu0 %v1504_v0 }
 0x15c   : > { %683 = vmatprep.subr.mxu1 %v647_v53  ;;  %v729_v58 = vpop.permute.xlu1 %728  ;;  %v1005_v5 = vpop.permute.xlu0 %1004 }
 0x15d   : > { %v731_v59 = vsel %vm730_vm6, %v727_v38, %v729_v58  ;;  %v732_v60 = vsel %vm730_vm6, %v729_v58, %v727_v38  ;;  %684 = vmatpush1.msra.mxu1 %v646_v52 }
 0x15e   : > { %v746_v62 = vmul.f32 %v739_v54, %v732_v60  ;;  %v747_v63 = vmul.f32 %v743_v55, %v731_v59  ;;  %861 = vmatprep.subr.mxu1 %v1592_v16  ;;  %1454 = vmatmul.mubr.msk.f32.vlgmr.msra.gmra.mxu1 %vm477_vm4, %v1453_v57 }
 0x15f   : > { %862 = vmatpush1.msra.mxu1 %v1588_v14  ;;  %895 = vmatprep.mubr.f32.mxu1 %v1504_v0  ;;  %v1461_v14 = vld [vmem:[%s1724_s2 + $0x28] sm:$0xff] }
 0x160   : > { %783 = vmatprep.subr.mxu0 %v747_v63  ;;  %v907_v6 = vpop.permute.xlu1 %906  ;;  %v1105_v18 = vpop.permute.xlu0 %1104 }
 0x161   : > { %v909_v7 = vsel %vm908_vm7, %v905_v51, %v907_v6  ;;  %v910_v8 = vsel %vm908_vm7, %v907_v6, %v905_v51  ;;  %784 = vmatpush1.msra.mxu0 %v746_v62 }
 0x162   : > { %v924_v10 = vmul.f32 %v917_v61, %v909_v7  ;;  %v925_v11 = vmul.f32 %v921_v1, %v910_v8  ;;  %1457 = vmatmul.mubr.msk.f32.vlgmr.msra.gmra.mxu0 %vm477_vm4, %v1456_v3  ;;  %1459 = vmatmul.mubr.msk.f32.vlgmr.msra.gmra.mxu1 %vm477_vm4, %v1458_v4 }
 0x163   : > { %995 = vmatprep.mubr.f32.mxu0 %v1504_v0  ;;  %1095 = vmatprep.mubr.f32.mxu1 %v1504_v0 }
 0x164   : > { %961 = vmatprep.subr.mxu0 %v925_v11  ;;  %v1007_v15 = vpop.permute.xlu1 %1006  ;;  %v1205_v36 = vpop.permute.xlu0 %1204 }
 0x165   : > { %v1009_v16 = vsel %vm1008_vm8, %v1005_v5, %v1007_v15  ;;  %v1010_v17 = vsel %vm1008_vm8, %v1007_v15, %v1005_v5  ;;  %962 = vmatpush1.msra.mxu0 %v924_v10 }
 0x166   : > { %v1024_v22 = vmul.f32 %v1017_v9, %v1009_v16  ;;  %v1025_v23 = vmul.f32 %v1021_v12, %v1010_v17  ;;  %1462 = vmatmul.mubr.msk.f32.vlgmr.msra.gmra.mxu0 %vm477_vm4, %v1461_v14 }
 0x167   : > { %1195 = vmatprep.mubr.f32.mxu0 %v1504_v0 }
 0x168   : > { %1061 = vmatprep.subr.mxu1 %v1025_v23  ;;  %v1107_v28 = vpop.permute.xlu1 %1106 }
 0x169   : > { %v1109_v29 = vsel %vm1108_vm9, %v1105_v18, %v1107_v28  ;;  %v1110_v30 = vsel %vm1108_vm9, %v1107_v28, %v1105_v18  ;;  %1062 = vmatpush1.msra.mxu1 %v1024_v22 }
 0x16a   : > { %v1124_v31 = vmul.f32 %v1117_v24, %v1109_v29  ;;  %v1125_v32 = vmul.f32 %v1121_v25, %v1110_v30  ;;  %1465 = vmatmul.mubr.msk.f32.vlgmr.msra.gmra.mxu1 %vm477_vm4, %v1464_v27 }
 0x16b   : > { %1295 = vmatprep.mubr.f32.mxu1 %v1504_v0 }
 0x16c   : > { %1161 = vmatprep.subr.mxu0 %v1125_v32  ;;  %v1207_v37 = vpop.permute.xlu1 %1206 }
 0x16d   : > { %v1209_v38 = vsel %vm1208_vm10, %v1205_v36, %v1207_v37  ;;  %v1210_v39 = vsel %vm1208_vm10, %v1207_v37, %v1205_v36  ;;  %1162 = vmatpush1.msra.mxu0 %v1124_v31 }
 0x16e   : > { %v1224_v19 = vmul.f32 %v1217_v33, %v1209_v38  ;;  %v1225_v40 = vmul.f32 %v1221_v34, %v1210_v39  ;;  %1468 = vmatmul.mubr.msk.f32.vlgmr.msra.gmra.mxu0 %vm477_vm4, %v1467_v35 }
 0x170   : > { %1261 = vmatprep.subr.mxu1 %v1225_v40 }
 0x171   : > { %1262 = vmatpush1.msra.mxu1 %v1224_v19 }
 0x172   : > { %1471 = vmatmul.mubr.msk.f32.vlgmr.msra.gmra.mxu1 %vm477_vm4, %v1470_v20 }
 0x216   : > { %v547_v21 = vpop.f32.mrf.mxu1 }
 0x218   : > { %v549_v0 = vpop.f32.mrf.mxu1 }
 0x21a   : > { %v621_v41 = vpop.f32.mrf.mxu0 }
 0x21b   : > { %v622_v42 = vadd.f32 %v621_v41, %v547_v21 }
 0x21c   : > { %v623_v43 = vpop.f32.mrf.mxu0 }
 0x21d   : > { %v624_v44 = vadd.f32 %v623_v43, %v549_v0 }
 0x21e   : > { %v719_v45 = vpop.f32.mrf.mxu1 }
 0x21f   : > { %v724_v46 = vadd.f32 %v719_v45, %v622_v42 }
 0x220   : > { %v721_v47 = vpop.f32.mrf.mxu1 }
 0x221   : > { %v725_v48 = vadd.f32 %v721_v47, %v624_v44 }
 0x222   : > { %v819_v49 = vpop.f32.mrf.mxu0  ;;  %v897_v50 = vpop.f32.mrf.mxu1 }
 0x223   : > { %v824_v51 = vadd.f32 %v819_v49, %v724_v46 }
 0x224   : > { %v821_v52 = vpop.f32.mrf.mxu0  ;;  %v899_v55 = vpop.f32.mrf.mxu1 }
 0x225   : > { %v825_v53 = vadd.f32 %v821_v52, %v725_v48  ;;  %v902_v54 = vadd.f32 %v897_v50, %v824_v51 }
 0x226   : > { %v997_v56 = vpop.f32.mrf.mxu0 }
 0x227   : > { %v903_v57 = vadd.f32 %v899_v55, %v825_v53  ;;  %v1002_v58 = vadd.f32 %v997_v56, %v902_v54 }
 0x228   : > { %v999_v59 = vpop.f32.mrf.mxu0 }
 0x229   : > { %v1003_v61 = vadd.f32 %v999_v59, %v903_v57 }
 0x22a   : > { %v1097_v60 = vpop.f32.mrf.mxu1 }
 0x22b   : > { %v1102_v62 = vadd.f32 %v1097_v60, %v1002_v58 }
 0x22c   : > { %v1099_v63 = vpop.f32.mrf.mxu1 }
 0x22d   : > { %v1103_v3 = vadd.f32 %v1099_v63, %v1003_v61 }
 0x22e   : > { %v1197_v1 = vpop.f32.mrf.mxu0 }
 0x22f   : > { %v1202_v4 = vadd.f32 %v1197_v1, %v1102_v62 }
 0x230   : > { %v1199_v2 = vpop.f32.mrf.mxu0 }
 0x231   : > { %v1203_v6 = vadd.f32 %v1199_v2, %v1103_v3 }
 0x232   : > { %v1297_v5 = vpop.f32.mrf.mxu1 }
 0x233   : > { %v1302_v7 = vadd.f32 %v1297_v5, %v1202_v4 }
 0x234   : > { %v1299_v8 = vpop.f32.mrf.mxu1 }
 0x235   : > { %1304 = vst [vmem:[%s318_s24] sm:$0xff] %v1302_v7  ;;  %v1303_v9 = vadd.f32 %v1299_v8, %v1203_v6  ;;  %v1311_v11 = vmul.f32 %v1302_v7, %v1302_v7 }
 0x237   : > { %1305 = vst [vmem:[%s318_s24 + $0x8] sm:$0xff] %v1303_v9  ;;  %v1306_v10 = vadd.f32 %v1303_v9, %v1302_v7  ;;  %v1312_v12 = vmul.f32 %v1303_v9, %v1303_v9 }
 0x239   : > { %1307 = vadd.xlane.f32.xlu0 %v1306_v10  ;;  %v1313_v13 = vadd.f32 %v1312_v12, %v1311_v11 }
 0x23b   : > { %1314 = vadd.xlane.f32.xlu1 %v1313_v13 }
 0x2c2   : > { %v1308_v14 = vpop.xlane.xlu0 %1307 }
 0x2c3   : > { %1310 = vst.msk [vmem:[%s322_s26] sm:$0xff] %vm1309_vm11, %v1308_v14 }
 0x2c4   : > { %v1315_v15 = vpop.xlane.xlu1 %1314 }
 0x2c5   : > { %1316 = vst.msk [vmem:[%s326_s9] sm:$0xff] %vm1309_vm11, %v1315_v15 }
 0x2c6 PF: > { %s19_s27 = sadd.s32 1, %s1502_s27  }
 0x2c7   : > { %p16_p4 = scmp.ge.s32.totalorder %s19_s27, 4  }
 0x2c9   :  { %18 = sbr.rel (!%p16_p4) target bundleno = 1 (0x1), region = 113 }

</bundles_post_ra>
